<compile_context>
chip_gen: v5e
topology: v5e:2x2
jax: 0.10.0
libtpu: 0.0.40
codegen_flags: <defaults>
</compile_context>

<pallas_src>
import numpy as np
import jax
import jax.numpy as jnp
from jax.experimental import pallas as pl
from jax.experimental.pallas import tpu as pltpu


def _round_up(x, m):
    return (x + m - 1) // m * m


def _pad2d(w, rows, cols):
    pr, pc = rows - w.shape[0], cols - w.shape[1]
    if pr == 0 and pc == 0:
        return w
    return jnp.pad(w, ((0, pr), (0, pc)))


# Feature-detect per-BlockSpec buffer-count control (single-buffer resident weights).
try:
    pl.BlockSpec((8, 128), lambda i: (0, 0), pipeline_mode=pl.Buffered(1))
    _HAS_PIPELINE_MODE = True
except Exception:  # older Pallas without pipeline_mode / Buffered
    _HAS_PIPELINE_MODE = False


def _vmem_capacity_bytes():
    """Physical VMEM of the attached TPU generation (fallback: v7x-sized 64 MiB)."""
    try:
        return int(pltpu.get_tpu_info().vmem_capacity_bytes)
    except Exception:
        return 64 << 20


# ----------------------------- kernels --------------------------------------

def sae_forward_kernel(x_ref, bd_ref, be_ref,
                       wpi_ref, we_ref, wdd_ref, wdec_ref, wpo_ref,
                       out_ref, acts_ref):
    """Parity path: per-layer (5-matmul) forward on one row tile. Weights VMEM-resident."""
    cdt = wpi_ref.dtype
    x = (x_ref[...].astype(jnp.float32) - bd_ref[...]).astype(cdt)                # x - b_d
    h = jnp.dot(x, wpi_ref[...], preferred_element_type=jnp.float32)              # project_in
    h = jnp.dot(h.astype(cdt), we_ref[...], preferred_element_type=jnp.float32)   # encoder
    h = jnp.dot(h.astype(cdt), wdd_ref[...], preferred_element_type=jnp.float32)  # dd_lin
    acts = jnp.maximum(h + be_ref[...], 0.0)           # undying_relu forward == relu
    acts_ref[...] = acts.astype(acts_ref.dtype)
    y = jnp.dot(acts.astype(cdt), wdec_ref[...], preferred_element_type=jnp.float32)  # decoder
    y = jnp.dot(y.astype(cdt), wpo_ref[...], preferred_element_type=jnp.float32)      # project_out
    out_ref[...] = (y + bd_ref[...]).astype(out_ref.dtype)


def sae_forward_fused_kernel(x_ref, bd_ref, beff_ref, wenc_ref, wdec_ref,
                             out_ref, acts_ref):
    """Fused 2-matmul forward: W_enc = Wpi^T We^T Wdd^T, W_dec = Wdec^T Wpo^T,
    b_eff = b_e - b_d @ W_enc (the x - b_d subtract is folded into the bias)."""
    cdt = wenc_ref.dtype
    h = jnp.dot(x_ref[...].astype(cdt), wenc_ref[...], preferred_element_type=jnp.float32)
    acts = jnp.maximum(h + beff_ref[...], 0.0)
    acts_c = acts.astype(cdt)                        # cast once, reuse for store + matmul
    acts_ref[...] = acts_c if acts_ref.dtype == cdt else acts.astype(acts_ref.dtype)
    y = jnp.dot(acts_c, wdec_ref[...], preferred_element_type=jnp.float32)
    out_ref[...] = (y + bd_ref[...]).astype(out_ref.dtype)


def sae_forward_fused_streamed_kernel(x_ref, bd_ref, beff_ref, wenc_ref, wdec_ref,
                                      out_ref, acts_ref, acc_ref):
    """Fused forward, streamed over d_dict blocks (grid axis j, 'arbitrary').
    acts block stored per (i, j); reconstruction accumulated in VMEM scratch."""
    j = pl.program_id(1)
    cdt = wenc_ref.dtype

    @pl.when(j == 0)
    def _():
        acc_ref[...] = jnp.zeros_like(acc_ref)

    h = jnp.dot(x_ref[...].astype(cdt), wenc_ref[...], preferred_element_type=jnp.float32)
    acts = jnp.maximum(h + beff_ref[...], 0.0)
    acts_c = acts.astype(cdt)
    acts_ref[...] = acts_c if acts_ref.dtype == cdt else acts.astype(acts_ref.dtype)
    acc_ref[...] += jnp.dot(acts_c, wdec_ref[...], preferred_element_type=jnp.float32)

    @pl.when(j == pl.num_programs(1) - 1)
    def _():
        out_ref[...] = (acc_ref[...] + bd_ref[...]).astype(out_ref.dtype)


# -------------------------- weight preparation -------------------------------

def prepare_params(params, *, compute_dtype=jnp.bfloat16, fuse=True):
    """One-time prep (per weight update): transpose to (in, out), zero-pad feature
    dims to multiples of 128, optionally pre-fuse the static weight chain, cast to
    the compute dtype. Biases stay f32. Default = fused bf16 production path."""
    d_dict, d_act = params["W_e"].shape
    da_p = _round_up(d_act, 128)
    dd_p = _round_up(d_dict, 128)

    f32 = jnp.float32
    wpi = params["W_pi"].astype(f32).T    # (d_act, d_act)
    we = params["W_e"].astype(f32).T      # (d_act, d_dict)
    wdd = params["W_dd"].astype(f32).T    # (d_dict, d_dict)
    wdec = params["W_dec"].astype(f32).T  # (d_dict, d_act)
    wpo = params["W_po"].astype(f32).T    # (d_act, d_act)
    bd = params["b_d"].astype(f32)
    be = params["b_e"].astype(f32)

    prep = {
        "d_act": d_act, "d_dict": d_dict,
        "d_act_pad": da_p, "d_dict_pad": dd_p,
        "fused": fuse, "compute_dtype": np.dtype(compute_dtype),
        "b_d": _pad2d(bd.reshape(1, d_act), 1, da_p),
    }
    if fuse:
        wenc = wpi @ we @ wdd                       # (d_act, d_dict)
        wdec_f = wdec @ wpo                         # (d_dict, d_act)
        be_eff = be - bd @ wenc                     # fold the b_d subtract into the bias
        prep["W_enc"] = _pad2d(wenc, da_p, dd_p).astype(compute_dtype)
        prep["W_dec"] = _pad2d(wdec_f, dd_p, da_p).astype(compute_dtype)
        prep["b_enc"] = _pad2d(be_eff.reshape(1, d_dict), 1, dd_p)
    else:
        prep["W_pi"] = _pad2d(wpi, da_p, da_p).astype(compute_dtype)
        prep["W_e"] = _pad2d(we, da_p, dd_p).astype(compute_dtype)
        prep["W_dd"] = _pad2d(wdd, dd_p, dd_p).astype(compute_dtype)
        prep["W_dec"] = _pad2d(wdec, dd_p, da_p).astype(compute_dtype)
        prep["W_po"] = _pad2d(wpo, da_p, da_p).astype(compute_dtype)
        prep["b_e"] = _pad2d(be.reshape(1, d_dict), 1, dd_p)
    return prep


# ------------------------------ tiling helpers --------------------------------

def _pick_row_tile(N, per_row_bytes, fixed_bytes, budget_bytes,
                   min_tile=128, max_tile=1024):
    """Largest MXU-friendly row tile that fits the VMEM budget (0 => does not fit)."""
    avail = budget_bytes - fixed_bytes
    if avail <= 0:
        return 0
    cap = min(max_tile, _round_up(N, 8), avail // max(per_row_bytes, 1))
    if cap < 8:
        return 0
    tn = 0
    for align in (256, 128, 8):     # 256-aligned for v6e/v7x MXU, 128 for v5e, 8 floor
        tn = (cap // align) * align
        if tn >= align:
            break
    if tn == 0 or tn < min(min_tile, _round_up(N, 8)):
        return 0
    # Keep >= ~8 row-grid steps for large N so both v7x TensorCores get work and
    # the x/out/acts DMAs stay hidden behind compute.
    if N >= 8 * 256:
        tn = max(256, min(tn, _round_up(-(-N // 8), 256)))
    return tn


# ------------------------------ forward --------------------------------------

def autoencoder_forward(x, prep, *, acts_dtype=None, out_dtype=jnp.float32,
                        row_tile=None, dd_tile=None, force_stream=False,
                        vmem_budget_bytes=None):
    """x: (N, d_act). Returns (reconstruction (N, d_act), acts (N, d_dict))."""
    N, d_act = x.shape
    assert d_act == prep["d_act"]
    d_dict = prep["d_dict"]
    da_p, dd_p = prep["d_act_pad"], prep["d_dict_pad"]
    cdt = prep["compute_dtype"]
    fused = prep["fused"]
    if acts_dtype is None:
        acts_dtype = cdt   # acts is the dominant store; match compute dtype by default
    cb = np.dtype(cdt).itemsize
    ab = np.dtype(acts_dtype).itemsize
    ob = np.dtype(out_dtype).itemsize
    xb = x.dtype.itemsize

    vmem_cap = _vmem_capacity_bytes()
    budget = int(vmem_budget_bytes) if vmem_budget_bytes is not None else int(vmem_cap * 0.80)
    wbuf = 1 if _HAS_PIPELINE_MODE else 2   # buffers actually kept per resident block

    def resident(arr):
        # Whole-array block with constant index -> stays VMEM-resident across the grid;
        # explicitly single-buffered when the installed Pallas supports pipeline_mode.
        if _HAS_PIPELINE_MODE:
            return pl.BlockSpec(arr.shape, lambda *_: (0, 0),
                                pipeline_mode=pl.Buffered(1))
        return pl.BlockSpec(arr.shape, lambda *_: (0, 0))

    if fused:
        weights = (prep["W_enc"], prep["W_dec"])
        biases = (prep["b_d"], prep["b_enc"])
    else:
        weights = (prep["W_pi"], prep["W_e"], prep["W_dd"], prep["W_dec"], prep["W_po"])
        biases = (prep["b_d"], prep["b_e"])
    resident_bytes = wbuf * sum(int(a.size) * a.dtype.itemsize for a in weights + biases)

    # Per-row VMEM cost of one row tile in the weight-resident kernels:
    # double-buffered x/out/acts blocks + f32/cdt intermediates held during compute.
    per_row_full = (2 * (da_p * xb + da_p * ob + dd_p * ab)
                    + 2 * dd_p * 4 + dd_p * cb + 2 * da_p * 4)

    if force_stream:
        assert fused, "the streamed path requires fuse=True preparation"
    use_stream = bool(force_stream)
    if fused and not use_stream and row_tile is None:
        rt = _pick_row_tile(N, per_row_full, resident_bytes, budget)
        if rt == 0:
            use_stream = True        # fused weights don't fit VMEM residency -> stream
        else:
            row_tile = rt
    if not fused and row_tile is None:
        # Parity/test path; no streamed fallback for the 5-matmul chain.
        row_tile = _pick_row_tile(N, per_row_full, resident_bytes, budget) or 8

    per_row_stream = fixed_stream = 0
    if use_stream:
        if dd_tile is None:
            k = dd_p // 128
            dd_tile = 128
            for d in range(min(k, 16), 0, -1):          # cap dd_tile at 2048
                if k % d == 0:
                    dd_tile = d * 128
                    break
        assert dd_p % dd_tile == 0 and dd_tile % 128 == 0
        per_row_stream = (2 * (da_p * xb + da_p * ob + dd_tile * ab)
                          + da_p * 4                           # f32 accumulator scratch
                          + 2 * dd_tile * 4 + dd_tile * cb)
        fixed_stream = (wbuf * int(prep["b_d"].size) * 4
                        + 2 * (da_p * dd_tile * cb + dd_tile * da_p * cb + dd_tile * 4))
        if row_tile is None:
            row_tile = (_pick_row_tile(N, per_row_stream, fixed_stream, budget)
                        or min(128, _round_up(N, 8)))

    row_tile = max(8, _round_up(int(row_tile), 8))
    N_pad = _round_up(N, row_tile)

    # Skip the wrapper-side pad when shapes are already aligned (no extra HBM pass);
    # the kernels cast x to the compute dtype internally.
    x_in = x if (N_pad == N and da_p == d_act) else _pad2d(x, N_pad, da_p)

    out_shapes = (jax.ShapeDtypeStruct((N_pad, da_p), out_dtype),    # reconstruction
                  jax.ShapeDtypeStruct((N_pad, dd_p), acts_dtype))   # acts_cached

    if not use_stream:
        kernel = sae_forward_fused_kernel if fused else sae_forward_kernel
        grid = (N_pad // row_tile,)
        in_specs = ([pl.BlockSpec((row_tile, da_p), lambda i: (i, 0))]
                    + [resident(b) for b in biases]
                    + [resident(w) for w in weights])
        out_specs = (pl.BlockSpec((row_tile, da_p), lambda i: (i, 0)),
                     pl.BlockSpec((row_tile, dd_p), lambda i: (i, 0)))
        scratch_shapes = ()
        operands = (x_in, *biases, *weights)
        dims = ("parallel",)
        vmem_needed = resident_bytes + row_tile * per_row_full + (2 << 20)
    else:
        kernel = sae_forward_fused_streamed_kernel
        grid = (N_pad // row_tile, dd_p // dd_tile)
        in_specs = [
            pl.BlockSpec((row_tile, da_p), lambda i, j: (i, 0)),   # x: resident across j
            resident(prep["b_d"]),                                  # b_d
            pl.BlockSpec((1, dd_tile), lambda i, j: (0, j)),        # b_enc slice
            pl.BlockSpec((da_p, dd_tile), lambda i, j: (0, j)),     # W_enc column block
            pl.BlockSpec((dd_tile, da_p), lambda i, j: (j, 0)),     # W_dec row block
        ]
        out_specs = (pl.BlockSpec((row_tile, da_p), lambda i, j: (i, 0)),
                     pl.BlockSpec((row_tile, dd_tile), lambda i, j: (i, j)))
        scratch_shapes = (pltpu.VMEM((row_tile, da_p), jnp.float32),)
        operands = (x_in, prep["b_d"], prep["b_enc"], prep["W_enc"], prep["W_dec"])
        dims = ("parallel", "arbitrary")
        vmem_needed = fixed_stream + row_tile * per_row_stream + (2 << 20)

    vmem_limit = int(min(max(vmem_needed, 32 << 20), int(vmem_cap * 0.9)))

    out_p, acts_p = pl.pallas_call(
        kernel,
        grid=grid,
        in_specs=in_specs,
        out_specs=out_specs,
        out_shape=out_shapes,
        scratch_shapes=scratch_shapes,
        compiler_params=pltpu.CompilerParams(
            dimension_semantics=dims,
            vmem_limit_bytes=vmem_limit,
        ),
    )(*operands)

    # Skip the trailing slices (extra HBM pass on acts) when nothing was padded.
    out = out_p if (N_pad == N and da_p == d_act) else out_p[:N, :d_act]
    acts = acts_p if (N_pad == N and dd_p == d_dict) else acts_p[:N, :d_dict]
    return out, acts


# ------------------------------ reference ------------------------------------

def reference_forward(x, params):
    bd = params["b_d"]
    be = params["b_e"]
    h = x - bd
    h = h @ params["W_pi"].T
    h = h @ params["W_e"].T
    h = h @ params["W_dd"].T
    acts = jnp.maximum(h + be, 0.0)
    y = acts @ params["W_dec"].T
    y = y @ params["W_po"].T
    return y + bd, acts


if __name__ == "__main__":
    # Small shapes consistent with the module: d_act -> d_dict -> d_act.
    N, d_act, d_dict = 16, 32, 64

    key = jax.random.PRNGKey(0)
    keys = jax.random.split(key, 6)

    # Deterministic synthetic parameters (torch nn.Linear layout: (out, in)).
    params = {
        "W_pi": jax.random.normal(keys[0], (d_act, d_act), jnp.float32) * 0.1,
        "W_e": jax.random.normal(keys[1], (d_dict, d_act), jnp.float32) * 0.1,
        "W_dd": jax.random.normal(keys[2], (d_dict, d_dict), jnp.float32) * 0.05,
        "W_dec": jax.random.normal(keys[3], (d_act, d_dict), jnp.float32) * 0.1,
        "W_po": jax.random.normal(keys[4], (d_act, d_act), jnp.float32) * 0.1,
        "b_d": jnp.full((d_act,), 0.01, jnp.float32),
        "b_e": jnp.full((d_dict,), 0.02, jnp.float32),
    }
    x = jax.random.normal(keys[5], (N, d_act), jnp.float32)

    ref_out, ref_acts = reference_forward(x, params)

    # 1) Exact-parity path: per-layer 5-matmul chain, f32 operands.
    prep_f32 = prepare_params(params, compute_dtype=jnp.float32, fuse=False)
    out, acts = autoencoder_forward(x, prep_f32, acts_dtype=jnp.float32)
    out, acts = jax.block_until_ready((out, acts))
    assert out.shape == (N, d_act) and acts.shape == (N, d_dict)
    assert jnp.allclose(out, ref_out, atol=1e-4, rtol=1e-4)
    assert jnp.allclose(acts, ref_acts, atol=1e-4, rtol=1e-4)

    # 2) Default production path: fused 2-matmul, bf16 operands (f32 MXU accum),
    #    bf16 acts writeback.
    prep_fast = prepare_params(params)
    out_f, acts_f = autoencoder_forward(x, prep_fast)
    out_f, acts_f = jax.block_until_ready((out_f, acts_f))
    assert jnp.allclose(out_f.astype(jnp.float32), ref_out, atol=5e-2, rtol=5e-2)
    assert jnp.allclose(acts_f.astype(jnp.float32), ref_acts, atol=5e-2, rtol=5e-2)

    # 3) d_dict-streamed fallback path (forced), f32 for a tight check; exercises
    #    the accumulator init/finalize over 3 dd blocks.
    N3, da3, dd3 = 32, 64, 384
    k2 = jax.random.split(keys[5], 7)
    params3 = {
        "W_pi": jax.random.normal(k2[0], (da3, da3), jnp.float32) * 0.1,
        "W_e": jax.random.normal(k2[1], (dd3, da3), jnp.float32) * 0.1,
        "W_dd": jax.random.normal(k2[2], (dd3, dd3), jnp.float32) * 0.05,
        "W_dec": jax.random.normal(k2[3], (da3, dd3), jnp.float32) * 0.1,
        "W_po": jax.random.normal(k2[4], (da3, da3), jnp.float32) * 0.1,
        "b_d": jax.random.normal(k2[5], (da3,), jnp.float32) * 0.01,
        "b_e": jax.random.normal(k2[6], (dd3,), jnp.float32) * 0.01,
    }
    x3 = jax.random.normal(k2[6], (N3, da3), jnp.float32)
    ref3_out, ref3_acts = reference_forward(x3, params3)
    prep3 = prepare_params(params3, compute_dtype=jnp.float32, fuse=True)
    out3, acts3 = autoencoder_forward(x3, prep3, acts_dtype=jnp.float32,
                                      force_stream=True, dd_tile=128)
    out3, acts3 = jax.block_until_ready((out3, acts3))
    assert out3.shape == (N3, da3) and acts3.shape == (N3, dd3)
    assert jnp.allclose(out3, ref3_out, atol=1e-3, rtol=1e-3)
    assert jnp.allclose(acts3, ref3_acts, atol=1e-3, rtol=1e-3)

    print("KERNEL_OK")
</pallas_src>

<mosaic_0001>
module attributes {stable_mosaic.version = 11 : i64} {
  func.func @sae_forward_kernel(%arg0: i32, %arg1: memref<16x128xf32, #tpu.memory_space<vmem>>, %arg2: memref<1x128xf32, #tpu.memory_space<vmem>>, %arg3: memref<1x128xf32, #tpu.memory_space<vmem>>, %arg4: memref<128x128xf32, #tpu.memory_space<vmem>>, %arg5: memref<128x128xf32, #tpu.memory_space<vmem>>, %arg6: memref<128x128xf32, #tpu.memory_space<vmem>>, %arg7: memref<128x128xf32, #tpu.memory_space<vmem>>, %arg8: memref<128x128xf32, #tpu.memory_space<vmem>>, %arg9: memref<16x128xf32, #tpu.memory_space<vmem>>, %arg10: memref<16x128xf32, #tpu.memory_space<vmem>>) attributes {dimension_semantics = [#tpu.dimension_semantics<parallel>], iteration_bounds = array<i64: 1>, scalar_prefetch = 0 : i64, scratch_operands = 0 : i64, tpu.core_type = #tpu.core_type<tc>, window_params = [{transform_indices = @transform_0, window_bounds = array<i64: 16, 128>}, {pipeline_mode = #tpu.pipeline_mode<synchronous>, transform_indices = @transform_1, window_bounds = array<i64: 1, 128>}, {pipeline_mode = #tpu.pipeline_mode<synchronous>, transform_indices = @transform_2, window_bounds = array<i64: 1, 128>}, {pipeline_mode = #tpu.pipeline_mode<synchronous>, transform_indices = @transform_3, window_bounds = array<i64: 128, 128>}, {pipeline_mode = #tpu.pipeline_mode<synchronous>, transform_indices = @transform_4, window_bounds = array<i64: 128, 128>}, {pipeline_mode = #tpu.pipeline_mode<synchronous>, transform_indices = @transform_5, window_bounds = array<i64: 128, 128>}, {pipeline_mode = #tpu.pipeline_mode<synchronous>, transform_indices = @transform_6, window_bounds = array<i64: 128, 128>}, {pipeline_mode = #tpu.pipeline_mode<synchronous>, transform_indices = @transform_7, window_bounds = array<i64: 128, 128>}, {transform_indices = @transform_8, window_bounds = array<i64: 16, 128>}, {transform_indices = @transform_9, window_bounds = array<i64: 16, 128>}]} {
    %c0 = arith.constant 0 : index
    %c0_0 = arith.constant 0 : index
    %0 = vector.load %arg1[%c0, %c0_0] : memref<16x128xf32, #tpu.memory_space<vmem>>, vector<16x128xf32>
    %c0_1 = arith.constant 0 : index
    %c0_2 = arith.constant 0 : index
    %1 = vector.load %arg2[%c0_1, %c0_2] : memref<1x128xf32, #tpu.memory_space<vmem>>, vector<1x128xf32>
    %2 = vector.broadcast %1 : vector<1x128xf32> to vector<16x128xf32>
    %3 = arith.subf %0, %2 : vector<16x128xf32>
    %c0_3 = arith.constant 0 : index
    %c0_4 = arith.constant 0 : index
    %4 = vector.load %arg4[%c0_3, %c0_4] : memref<128x128xf32, #tpu.memory_space<vmem>>, vector<128x128xf32>
    %cst = arith.constant dense<0.000000e+00> : vector<16x128xf32>
    %5 = tpu.matmul %3, %4, %cst {dimension_numbers = #tpu.dot_dimension_numbers<[1], [0], [0], [1], [0, 0, 1, 1], [], []>} : vector<16x128xf32>, vector<128x128xf32>, vector<16x128xf32> -> vector<16x128xf32>
    %c0_5 = arith.constant 0 : index
    %c0_6 = arith.constant 0 : index
    %6 = vector.load %arg5[%c0_5, %c0_6] : memref<128x128xf32, #tpu.memory_space<vmem>>, vector<128x128xf32>
    %cst_7 = arith.constant dense<0.000000e+00> : vector<16x128xf32>
    %7 = tpu.matmul %5, %6, %cst_7 {dimension_numbers = #tpu.dot_dimension_numbers<[1], [0], [0], [1], [0, 0, 1, 1], [], []>} : vector<16x128xf32>, vector<128x128xf32>, vector<16x128xf32> -> vector<16x128xf32>
    %c0_8 = arith.constant 0 : index
    %c0_9 = arith.constant 0 : index
    %8 = vector.load %arg6[%c0_8, %c0_9] : memref<128x128xf32, #tpu.memory_space<vmem>>, vector<128x128xf32>
    %cst_10 = arith.constant dense<0.000000e+00> : vector<16x128xf32>
    %9 = tpu.matmul %7, %8, %cst_10 {dimension_numbers = #tpu.dot_dimension_numbers<[1], [0], [0], [1], [0, 0, 1, 1], [], []>} : vector<16x128xf32>, vector<128x128xf32>, vector<16x128xf32> -> vector<16x128xf32>
    %c0_11 = arith.constant 0 : index
    %c0_12 = arith.constant 0 : index
    %10 = vector.load %arg3[%c0_11, %c0_12] : memref<1x128xf32, #tpu.memory_space<vmem>>, vector<1x128xf32>
    %11 = vector.broadcast %10 : vector<1x128xf32> to vector<16x128xf32>
    %12 = arith.addf %9, %11 : vector<16x128xf32>
    %cst_13 = arith.constant 0.000000e+00 : f32
    %13 = vector.broadcast %cst_13 : f32 to vector<16x128xf32>
    %14 = arith.maximumf %12, %13 : vector<16x128xf32>
    %c0_14 = arith.constant 0 : index
    %c0_15 = arith.constant 0 : index
    %15 = vector.load %arg10[%c0_14, %c0_15] : memref<16x128xf32, #tpu.memory_space<vmem>>, vector<16x128xf32>
    tpu.vector_store %arg10[%c0_14, %c0_15], %14 {strides = array<i32>} : memref<16x128xf32, #tpu.memory_space<vmem>>, vector<16x128xf32>,
    %c0_16 = arith.constant 0 : index
    %c0_17 = arith.constant 0 : index
    %16 = vector.load %arg7[%c0_16, %c0_17] : memref<128x128xf32, #tpu.memory_space<vmem>>, vector<128x128xf32>
    %cst_18 = arith.constant dense<0.000000e+00> : vector<16x128xf32>
    %17 = tpu.matmul %14, %16, %cst_18 {dimension_numbers = #tpu.dot_dimension_numbers<[1], [0], [0], [1], [0, 0, 1, 1], [], []>} : vector<16x128xf32>, vector<128x128xf32>, vector<16x128xf32> -> vector<16x128xf32>
    %c0_19 = arith.constant 0 : index
    %c0_20 = arith.constant 0 : index
    %18 = vector.load %arg8[%c0_19, %c0_20] : memref<128x128xf32, #tpu.memory_space<vmem>>, vector<128x128xf32>
    %cst_21 = arith.constant dense<0.000000e+00> : vector<16x128xf32>
    %19 = tpu.matmul %17, %18, %cst_21 {dimension_numbers = #tpu.dot_dimension_numbers<[1], [0], [0], [1], [0, 0, 1, 1], [], []>} : vector<16x128xf32>, vector<128x128xf32>, vector<16x128xf32> -> vector<16x128xf32>
    %c0_22 = arith.constant 0 : index
    %c0_23 = arith.constant 0 : index
    %20 = vector.load %arg2[%c0_22, %c0_23] : memref<1x128xf32, #tpu.memory_space<vmem>>, vector<1x128xf32>
    %21 = vector.broadcast %20 : vector<1x128xf32> to vector<16x128xf32>
    %22 = arith.addf %19, %21 : vector<16x128xf32>
    %c0_24 = arith.constant 0 : index
    %c0_25 = arith.constant 0 : index
    %23 = vector.load %arg9[%c0_24, %c0_25] : memref<16x128xf32, #tpu.memory_space<vmem>>, vector<16x128xf32>
    tpu.vector_store %arg9[%c0_24, %c0_25], %22 {strides = array<i32>} : memref<16x128xf32, #tpu.memory_space<vmem>>, vector<16x128xf32>,
    return
  }
  func.func @transform_0(%arg0: i32) -> (i32, i32) {
    %c0_i32 = arith.constant 0 : i32
    %c0_i32_0 = arith.constant 0 : i32
    return %arg0, %c0_i32 : i32, i32
  }
  func.func @transform_1(%arg0: i32) -> (i32, i32) {
    %c0_i32 = arith.constant 0 : i32
    %c0_i32_0 = arith.constant 0 : i32
    %c0_i32_1 = arith.constant 0 : i32
    return %c0_i32, %c0_i32_0 : i32, i32
  }
  func.func @transform_2(%arg0: i32) -> (i32, i32) {
    %c0_i32 = arith.constant 0 : i32
    %c0_i32_0 = arith.constant 0 : i32
    %c0_i32_1 = arith.constant 0 : i32
    return %c0_i32, %c0_i32_0 : i32, i32
  }
  func.func @transform_3(%arg0: i32) -> (i32, i32) {
    %c0_i32 = arith.constant 0 : i32
    %c0_i32_0 = arith.constant 0 : i32
    %c0_i32_1 = arith.constant 0 : i32
    return %c0_i32, %c0_i32_0 : i32, i32
  }
  func.func @transform_4(%arg0: i32) -> (i32, i32) {
    %c0_i32 = arith.constant 0 : i32
    %c0_i32_0 = arith.constant 0 : i32
    %c0_i32_1 = arith.constant 0 : i32
    return %c0_i32, %c0_i32_0 : i32, i32
  }
  func.func @transform_5(%arg0: i32) -> (i32, i32) {
    %c0_i32 = arith.constant 0 : i32
    %c0_i32_0 = arith.constant 0 : i32
    %c0_i32_1 = arith.constant 0 : i32
    return %c0_i32, %c0_i32_0 : i32, i32
  }
  func.func @transform_6(%arg0: i32) -> (i32, i32) {
    %c0_i32 = arith.constant 0 : i32
    %c0_i32_0 = arith.constant 0 : i32
    %c0_i32_1 = arith.constant 0 : i32
    return %c0_i32, %c0_i32_0 : i32, i32
  }
  func.func @transform_7(%arg0: i32) -> (i32, i32) {
    %c0_i32 = arith.constant 0 : i32
    %c0_i32_0 = arith.constant 0 : i32
    %c0_i32_1 = arith.constant 0 : i32
    return %c0_i32, %c0_i32_0 : i32, i32
  }
  func.func @transform_8(%arg0: i32) -> (i32, i32) {
    %c0_i32 = arith.constant 0 : i32
    %c0_i32_0 = arith.constant 0 : i32
    return %arg0, %c0_i32 : i32, i32
  }
  func.func @transform_9(%arg0: i32) -> (i32, i32) {
    %c0_i32 = arith.constant 0 : i32
    %c0_i32_0 = arith.constant 0 : i32
    return %arg0, %c0_i32 : i32, i32
  }
}

</mosaic_0001>

<bundles_post_ra>
// kernel: tpu_custom_call.1
= control target key start
LH: loop header
LB: loop body
LE: loop exit
PB: predicated region body
PF: predicated region fallthrough
CT: control target
= control target key end

     0   :  { %15 = vsyncpa [#allocation3], 0  ;;  %s770_s0 = inlined_call_operand.hbm [shape: f32[16,128], index: 0, kind: input, shape index: {}]   ;;  %s771_s1 = inlined_call_operand.hbm [shape: f32[1,128], index: 1, kind: input, shape index: {}]   ;;  %s772_s2 = inlined_call_operand.vmem [shape: f32[1,128], index: 2, kind: input, shape index: {}]   ;;  %s773_s3 = inlined_call_operand.hbm [shape: f32[128,128], index: 3, kind: input, shape index: {}]   ;;  %s774_s4 = inlined_call_operand.hbm [shape: f32[128,128], index: 4, kind: input, shape index: {}]   ;;  %s775_s5 = inlined_call_operand.hbm [shape: f32[128,128], index: 5, kind: input, shape index: {}]   ;;  %s776_s6 = inlined_call_operand.hbm [shape: f32[128,128], index: 6, kind: input, shape index: {}]   ;;  %s777_s7 = inlined_call_operand.hbm [shape: f32[128,128], index: 7, kind: input, shape index: {}]   ;;  %s778_s8 = inlined_call_operand.hbm [shape: f32[16,128], index: 8, kind: output, shape index: {0}]   ;;  %s779_s9 = inlined_call_operand.hbm [shape: f32[16,128], index: 9, kind: output, shape index: {1}]  }
   0x1   :  { %16 = vsyncpa [#allocation6], 0 }
   0x2   :  { %17 = vsyncpa [#allocation9], 0 }
   0x3   :  { %18 = vsyncpa [#allocation12], 0 }
   0x4   :  { %19 = vsyncpa [#allocation4], 0  ;;  %s39_s11 = sshll.u32 %s771_s1, 4  ;;  %s40_s11 = int_to_ptr.hbm [resolvable:$true] %s39_s11 }
   0x5   :  { %20 = vsyncpa [#allocation16], 0  ;;  %s655_s12 = smov [#allocation5]   ;;  %s64_s16 = sshll.u32 %s774_s4, 4  ;;  %s65_s16 = int_to_ptr.hbm [resolvable:$true] %s64_s16 }
   0x6   :  { %s41_s13 = sshll.u32 %s655_s12, 4  ;;  %s656_s17 = smov [#allocation8]   ;;  %s42_s13 = int_to_ptr.vmem [resolvable:$true] %s41_s13 }
   0x7   :  { %44 = dma.hbm_to_vmem [thread:$0]  %s40_s11, 16, %s42_s13, [#allocation6]  }
   0x8   :  { %s66_s18 = sshll.u32 %s656_s17, 4  ;;  %s90_s21 = sshll.u32 %s776_s6, 4  ;;  %s67_s18 = int_to_ptr.vmem [resolvable:$true] %s66_s18  ;;  %s91_s21 = int_to_ptr.hbm [resolvable:$true] %s90_s21 }
   0x9   :  { %s657_s1 = smov 128   ;;  %s658_s22 = smov 8  }
   0xa   :  { %72 = dma.hbm_to_vmem [thread:$0]  %s65_s16, 2048, %s67_s18, [#allocation9], %s657_s1, %s657_s1, %s658_s22  }
   0xb   :  { %s25_s25 = sshll.u32 %s770_s0, 4  ;;  %s659_s4 = smov [#allocation11]   ;;  %s26_s25 = int_to_ptr.hbm [resolvable:$true] %s25_s25 }
   0xc   :  { %s92_s26 = sshll.u32 %s659_s4, 4  ;;  %s660_s6 = smov [#allocation2]   ;;  %s93_s26 = int_to_ptr.vmem [resolvable:$true] %s92_s26 }
   0xd   :  { %98 = dma.hbm_to_vmem [thread:$0]  %s91_s21, 2048, %s93_s26, [#allocation12], %s657_s1, %s657_s1, %s658_s22  }
   0xe   :  { %s27_s27 = sshll.u32 %s660_s6, 4  ;;  %s51_s30 = sshll.u32 %s773_s3, 4  ;;  %s28_s27 = int_to_ptr.vmem [resolvable:$true] %s27_s27  ;;  %s52_s30 = int_to_ptr.hbm [resolvable:$true] %s51_s30 }
   0xf   :  { %33 = dma.hbm_to_vmem [thread:$0]  %s26_s25, 256, %s28_s27, [#allocation3], %s657_s1, %s657_s1, %s658_s22  }
  0x10   :  { %s77_s11 = sshll.u32 %s775_s5, 4  ;;  %s661_s12 = smov [#allocation7]   ;;  %s78_s11 = int_to_ptr.hbm [resolvable:$true] %s77_s11 }
  0x11   :  { %s53_s13 = sshll.u32 %s661_s12, 4  ;;  %s662_s14 = smov [#allocation10]   ;;  %s54_s13 = int_to_ptr.vmem [resolvable:$true] %s53_s13 }
  0x12   :  { %59 = dma.hbm_to_vmem [thread:$0]  %s52_s30, 2048, %s54_s13, [#allocation6], %s657_s1, %s657_s1, %s658_s22  }
  0x13   :  { %s79_s3 = sshll.u32 %s662_s14, 4  ;;  %s103_s17 = sshll.u32 %s777_s7, 4  ;;  %s80_s3 = int_to_ptr.vmem [resolvable:$true] %s79_s3  ;;  %s104_s17 = int_to_ptr.hbm [resolvable:$true] %s103_s17 }
  0x14   :  { %85 = dma.hbm_to_vmem [thread:$0]  %s78_s11, 2048, %s80_s3, [#allocation9], %s657_s1, %s657_s1, %s658_s22  }
  0x15   :  { %s663_s5 = smov [#allocation13]  }
  0x16   :  { %s105_s18 = sshll.u32 %s663_s5, 4  ;;  %s106_s18 = int_to_ptr.vmem [resolvable:$true] %s105_s18 }
  0x17   :  { %111 = dma.hbm_to_vmem [thread:$0]  %s104_s17, 2048, %s106_s18, [#allocation12], %s657_s1, %s657_s1, %s658_s22  }
  0x18   :  { %643 = dma.done.wait [#allocation3], 256  }
  0x19   :  { %644 = vsyncadd [#allocation3], 4294967040 }
  0x1a   :  { %645 = dma.done.wait [#allocation6], 2064  }
  0x1b   :  { %646 = vsyncadd [#allocation6], 4294965232 }
  0x1c   :  { %647 = dma.done.wait [#allocation9], 4096  }
  0x1d   :  { %648 = vsyncadd [#allocation9], 4294963200 }
  0x1e   :  { %649 = dma.done.wait [#allocation12], 4096  }
  0x1f   :  { %650 = vsyncadd [#allocation12], 4294963200  ;;  %v163_v0 = vld [vmem:[#allocation7 + $0x78] sm:$0xff]  ;;  %v162_v1 = vld [vmem:[#allocation7 + $0x70] sm:$0xff]  ;;  %s376_s24 = sshll.u32 %s779_s9, 4  ;;  %s665_s25 = smov [#allocation14]   ;;  %s377_s24 = int_to_ptr.hbm [resolvable:$true] %s376_s24 }
  0x20   :  { %164 = vmatpush.msra.mxu0 %v163_v0  ;;  %v161_v2 = vld [vmem:[#allocation7 + $0x68] sm:$0xff]  ;;  %v160_v3 = vld [vmem:[#allocation7 + $0x60] sm:$0xff]  ;;  %v159_v4 = vld [vmem:[#allocation7 + $0x58] sm:$0xff]  ;;  %s361_s4 = sshll.u32 %s665_s25, 4  ;;  %s363_s27 = sshll.u32 %s778_s8, 4  ;;  %s362_s4 = int_to_ptr.vmem [resolvable:$true] %s361_s4  ;;  %s364_s27 = int_to_ptr.hbm [resolvable:$true] %s363_s27 }
  0x21   :  { %v158_v5 = vld [vmem:[#allocation7 + $0x50] sm:$0xff]  ;;  %v202_v6 = vld [vmem:[#allocation8 + $0x78] sm:$0xff]  ;;  %v157_v8 = vld [vmem:[#allocation7 + $0x48] sm:$0xff] }
  0x22   :  { %165 = vmatpush.msra.mxu0 %v162_v1  ;;  %v201_v7 = vld [vmem:[#allocation8 + $0x70] sm:$0xff]  ;;  %203 = vmatpush.msra.mxu1 %v202_v6  ;;  %v200_v9 = vld [vmem:[#allocation8 + $0x68] sm:$0xff]  ;;  %v156_v10 = vld [vmem:[#allocation7 + $0x40] sm:$0xff] }
  0x23   :  { %v199_v11 = vld [vmem:[#allocation8 + $0x60] sm:$0xff]  ;;  %v155_v12 = vld [vmem:[#allocation7 + $0x38] sm:$0xff]  ;;  %v154_v14 = vld [vmem:[#allocation7 + $0x30] sm:$0xff] }
  0x24   :  { %166 = vmatpush.msra.mxu0 %v161_v2  ;;  %204 = vmatpush.msra.mxu1 %v201_v7  ;;  %v198_v13 = vld [vmem:[#allocation8 + $0x58] sm:$0xff]  ;;  %v197_v15 = vld [vmem:[#allocation8 + $0x50] sm:$0xff]  ;;  %v153_v16 = vld [vmem:[#allocation7 + $0x28] sm:$0xff] }
  0x25   :  { %v196_v17 = vld [vmem:[#allocation8 + $0x48] sm:$0xff]  ;;  %v152_v18 = vld [vmem:[#allocation7 + $0x20] sm:$0xff]  ;;  %v151_v20 = vld [vmem:[#allocation7 + $0x18] sm:$0xff] }
  0x26   :  { %167 = vmatpush.msra.mxu0 %v160_v3  ;;  %205 = vmatpush.msra.mxu1 %v200_v9  ;;  %v195_v19 = vld [vmem:[#allocation8 + $0x40] sm:$0xff]  ;;  %v194_v21 = vld [vmem:[#allocation8 + $0x38] sm:$0xff]  ;;  %v150_v22 = vld [vmem:[#allocation7 + $0x10] sm:$0xff] }
  0x27   :  { %v424_v23 = vld [vmem:[#allocation5] ss:$0 sm:$0xff]  ;;  %v193_v24 = vld [vmem:[#allocation8 + $0x30] sm:$0xff]  ;;  %v149_v26 = vld [vmem:[#allocation7 + $0x8] sm:$0xff] }
  0x28   :  { %168 = vmatpush.msra.mxu0 %v159_v4  ;;  %206 = vmatpush.msra.mxu1 %v199_v11  ;;  %v140_v25 = vld [vmem:[#allocation2] sm:$0xff]  ;;  %v148_v28 = vld [vmem:[#allocation7] sm:$0xff]  ;;  %v190_v31 = vld [vmem:[#allocation8 + $0x18] sm:$0xff] }
  0x29   :  { %v192_v27 = vld [vmem:[#allocation8 + $0x28] sm:$0xff]  ;;  %v146_v29 = vsub.f32 %v140_v25, %v424_v23  ;;  %v191_v30 = vld [vmem:[#allocation8 + $0x20] sm:$0xff]  ;;  %v189_v32 = vld [vmem:[#allocation8 + $0x10] sm:$0xff] }
  0x2a   :  { %169 = vmatpush.msra.mxu0 %v158_v5  ;;  %207 = vmatpush.msra.mxu1 %v198_v13  ;;  %v141_v33 = vld [vmem:[#allocation2 + $0x8] sm:$0xff]  ;;  %v188_v34 = vld [vmem:[#allocation8 + $0x8] sm:$0xff]  ;;  %v187_v36 = vld [vmem:[#allocation8] sm:$0xff] }
  0x2b   :  { %v147_v35 = vsub.f32 %v141_v33, %v424_v23  ;;  %v241_v37 = vld [vmem:[#allocation10 + $0x78] sm:$0xff]  ;;  %v240_v38 = vld [vmem:[#allocation10 + $0x70] sm:$0xff]  ;;  %v239_v39 = vld [vmem:[#allocation10 + $0x68] sm:$0xff] }
  0x2c   :  { %170 = vmatpush.msra.mxu0 %v157_v8  ;;  %208 = vmatpush.msra.mxu1 %v197_v15  ;;  %v238_v40 = vld [vmem:[#allocation10 + $0x60] sm:$0xff]  ;;  %v237_v41 = vld [vmem:[#allocation10 + $0x58] sm:$0xff]  ;;  %v236_v42 = vld [vmem:[#allocation10 + $0x50] sm:$0xff] }
  0x2d   :  { %246 = vmatpush.msra.mxu2 %v241_v37  ;;  %v235_v43 = vld [vmem:[#allocation10 + $0x48] sm:$0xff]  ;;  %v234_v44 = vld [vmem:[#allocation10 + $0x40] sm:$0xff]  ;;  %v233_v45 = vld [vmem:[#allocation10 + $0x38] sm:$0xff] }
  0x2e   :  { %171 = vmatpush.msra.mxu0 %v156_v10  ;;  %209 = vmatpush.msra.mxu1 %v196_v17  ;;  %v232_v46 = vld [vmem:[#allocation10 + $0x30] sm:$0xff]  ;;  %v231_v47 = vld [vmem:[#allocation10 + $0x28] sm:$0xff]  ;;  %v230_v48 = vld [vmem:[#allocation10 + $0x20] sm:$0xff] }
  0x2f   :  { %247 = vmatpush.msra.mxu2 %v240_v38  ;;  %v229_v49 = vld [vmem:[#allocation10 + $0x18] sm:$0xff]  ;;  %v228_v51 = vld [vmem:[#allocation10 + $0x10] sm:$0xff]  ;;  %v227_v52 = vld [vmem:[#allocation10 + $0x8] sm:$0xff] }
  0x30   :  { %172 = vmatpush.msra.mxu0 %v155_v12  ;;  %210 = vmatpush.msra.mxu1 %v195_v19  ;;  %v226_v54 = vld [vmem:[#allocation10] sm:$0xff]  ;;  %v288_v55 = vld [vmem:[#allocation11 + $0x78] sm:$0xff]  ;;  %v287_v56 = vld [vmem:[#allocation11 + $0x70] sm:$0xff] }
  0x31   :  { %248 = vmatpush.msra.mxu2 %v239_v39  ;;  %289 = vmatpush.msra.mxu3 %v288_v55  ;;  %v286_v57 = vld [vmem:[#allocation11 + $0x68] sm:$0xff]  ;;  %v285_v58 = vld [vmem:[#allocation11 + $0x60] sm:$0xff]  ;;  %v284_v59 = vld [vmem:[#allocation11 + $0x58] sm:$0xff] }
  0x32   :  { %173 = vmatpush.msra.mxu0 %v154_v14  ;;  %211 = vmatpush.msra.mxu1 %v194_v21  ;;  %v283_v60 = vld [vmem:[#allocation11 + $0x50] sm:$0xff]  ;;  %v282_v61 = vld [vmem:[#allocation11 + $0x48] sm:$0xff]  ;;  %v281_v62 = vld [vmem:[#allocation11 + $0x40] sm:$0xff] }
  0x33   :  { %249 = vmatpush.msra.mxu2 %v238_v40  ;;  %290 = vmatpush.msra.mxu3 %v287_v56  ;;  %v280_v63 = vld [vmem:[#allocation11 + $0x38] sm:$0xff]  ;;  %v279_v0 = vld [vmem:[#allocation11 + $0x30] sm:$0xff]  ;;  %v278_v1 = vld [vmem:[#allocation11 + $0x28] sm:$0xff] }
  0x34   :  { %174 = vmatpush.msra.mxu0 %v153_v16  ;;  %212 = vmatpush.msra.mxu1 %v193_v24  ;;  %v277_v2 = vld [vmem:[#allocation11 + $0x20] sm:$0xff]  ;;  %v276_v3 = vld [vmem:[#allocation11 + $0x18] sm:$0xff]  ;;  %v275_v6 = vld [vmem:[#allocation11 + $0x10] sm:$0xff] }
  0x35   :  { %250 = vmatpush.msra.mxu2 %v237_v41  ;;  %291 = vmatpush.msra.mxu3 %v286_v57  ;;  %v274_v7 = vld [vmem:[#allocation11 + $0x8] sm:$0xff]  ;;  %v273_v8 = vld [vmem:[#allocation11] sm:$0xff]  ;;  %v327_v9 = vld [vmem:[#allocation13 + $0x78] sm:$0xff] }
  0x36   :  { %175 = vmatpush.msra.mxu0 %v152_v18  ;;  %213 = vmatpush.msra.mxu1 %v192_v27  ;;  %v326_v10 = vld [vmem:[#allocation13 + $0x70] sm:$0xff]  ;;  %v325_v11 = vld [vmem:[#allocation13 + $0x68] sm:$0xff]  ;;  %v324_v12 = vld [vmem:[#allocation13 + $0x60] sm:$0xff] }
  0x37   :  { %251 = vmatpush.msra.mxu2 %v236_v42  ;;  %292 = vmatpush.msra.mxu3 %v285_v58  ;;  %v323_v13 = vld [vmem:[#allocation13 + $0x58] sm:$0xff]  ;;  %v322_v14 = vld [vmem:[#allocation13 + $0x50] sm:$0xff]  ;;  %v321_v15 = vld [vmem:[#allocation13 + $0x48] sm:$0xff] }
  0x38   :  { %176 = vmatpush.msra.mxu0 %v151_v20  ;;  %214 = vmatpush.msra.mxu1 %v191_v30  ;;  %v320_v16 = vld [vmem:[#allocation13 + $0x40] sm:$0xff]  ;;  %v319_v17 = vld [vmem:[#allocation13 + $0x38] sm:$0xff]  ;;  %v425_v18 = vld [vmem:[%s772_s2] ss:$0 sm:$0xff]  ;;  %s664_s2 = smov [#allocation15]  }
  0x39   :  { %252 = vmatpush.msra.mxu2 %v235_v43  ;;  %293 = vmatpush.msra.mxu3 %v284_v59  ;;  %v318_v19 = vld [vmem:[#allocation13 + $0x30] sm:$0xff]  ;;  %v317_v20 = vld [vmem:[#allocation13 + $0x28] sm:$0xff]  ;;  %v316_v23 = vld [vmem:[#allocation13 + $0x20] sm:$0xff]  ;;  %s374_s20 = sshll.u32 %s664_s2, 4  ;;  %s375_s20 = int_to_ptr.vmem [resolvable:$true] %s374_s20 }
  0x3a   :  { %177 = vmatpush.msra.mxu0 %v150_v22  ;;  %215 = vmatpush.msra.mxu1 %v190_v31  ;;  %v315_v25 = vld [vmem:[#allocation13 + $0x18] sm:$0xff]  ;;  %v313_v27 = vld [vmem:[#allocation13 + $0x8] sm:$0xff]  ;;  %v312_v31 = vld [vmem:[#allocation13] sm:$0xff] }
  0x3b   :  { %253 = vmatpush.msra.mxu2 %v234_v44  ;;  %294 = vmatpush.msra.mxu3 %v283_v60 }
  0x3c   :  { %178 = vmatpush.msra.mxu0 %v149_v26  ;;  %216 = vmatpush.msra.mxu1 %v189_v32  ;;  %v314_v26 = vld [vmem:[#allocation13 + $0x10] sm:$0xff] }
  0x3d   :  { %254 = vmatpush.msra.mxu2 %v233_v45  ;;  %295 = vmatpush.msra.mxu3 %v282_v61 }
  0x3e   :  { %179 = vmatpush.msra.mxu0 %v148_v28  ;;  %217 = vmatpush.msra.mxu1 %v188_v34  ;;  %v426_v34 = vld [vmem:[#allocation5] ss:$0 sm:$0xff] }
  0x3f   :  { %180 = vmatmul.f32.vlgmr.msra.gmra.mxu0 %v146_v29  ;;  %255 = vmatpush.msra.mxu2 %v232_v46 }
  0x40   :  { %218 = vmatpush.msra.mxu1 %v187_v36  ;;  %296 = vmatpush.msra.mxu3 %v281_v62 }
  0x41   :  { %256 = vmatpush.msra.mxu2 %v231_v47  ;;  %332 = vmatpush.msrb.mxu0 %v327_v9 }
  0x42   :  { %297 = vmatpush.msra.mxu3 %v280_v63  ;;  %397 = vmatpush.msrb.mxu1 %v327_v9 }
  0x43   :  { %257 = vmatpush.msra.mxu2 %v230_v48  ;;  %333 = vmatpush.msrb.mxu0 %v326_v10 }
  0x44   :  { %298 = vmatpush.msra.mxu3 %v279_v0  ;;  %398 = vmatpush.msrb.mxu1 %v326_v10 }
  0x45   :  { %258 = vmatpush.msra.mxu2 %v229_v49  ;;  %334 = vmatpush.msrb.mxu0 %v325_v11 }
  0x46   :  { %299 = vmatpush.msra.mxu3 %v278_v1  ;;  %399 = vmatpush.msrb.mxu1 %v325_v11 }
  0x47   :  { %183 = vmatmul.f32.gmra.mxu0 %v147_v35  ;;  %259 = vmatpush.msra.mxu2 %v228_v51 }
  0x48   :  { %300 = vmatpush.msra.mxu3 %v277_v2  ;;  %335 = vmatpush.msrb.mxu0 %v324_v12 }
  0x49   :  { %260 = vmatpush.msra.mxu2 %v227_v52  ;;  %400 = vmatpush.msrb.mxu1 %v324_v12 }
  0x4a   :  { %301 = vmatpush.msra.mxu3 %v276_v3  ;;  %336 = vmatpush.msrb.mxu0 %v323_v13 }
  0x4b   :  { %261 = vmatpush.msra.mxu2 %v226_v54  ;;  %401 = vmatpush.msrb.mxu1 %v323_v13 }
  0x4c   :  { %302 = vmatpush.msra.mxu3 %v275_v6  ;;  %337 = vmatpush.msrb.mxu0 %v322_v14 }
  0x4d   :  { %402 = vmatpush.msrb.mxu1 %v322_v14 }
  0x4e   :  { %303 = vmatpush.msra.mxu3 %v274_v7  ;;  %338 = vmatpush.msrb.mxu0 %v321_v15 }
  0x4f   :  { %403 = vmatpush.msrb.mxu1 %v321_v15 }
  0x50   :  { %304 = vmatpush.msra.mxu3 %v273_v8  ;;  %339 = vmatpush.msrb.mxu0 %v320_v16 }
  0x51   :  { %404 = vmatpush.msrb.mxu1 %v320_v16 }
  0x52   :  { %340 = vmatpush.msrb.mxu0 %v319_v17 }
  0x53   :  { %405 = vmatpush.msrb.mxu1 %v319_v17 }
  0x54   :  { %341 = vmatpush.msrb.mxu0 %v318_v19 }
  0x55   :  { %406 = vmatpush.msrb.mxu1 %v318_v19 }
  0x56   :  { %342 = vmatpush.msrb.mxu0 %v317_v20 }
  0x57   :  { %407 = vmatpush.msrb.mxu1 %v317_v20 }
  0x58   :  { %343 = vmatpush.msrb.mxu0 %v316_v23 }
  0x59   :  { %408 = vmatpush.msrb.mxu1 %v316_v23 }
  0x5a   :  { %344 = vmatpush.msrb.mxu0 %v315_v25 }
  0x5b   :  { %409 = vmatpush.msrb.mxu1 %v315_v25 }
  0x5c   :  { %345 = vmatpush.msrb.mxu0 %v314_v26 }
  0x5d   :  { %410 = vmatpush.msrb.mxu1 %v314_v26 }
  0x5e   :  { %346 = vmatpush.msrb.mxu0 %v313_v27 }
  0x5f   :  { %411 = vmatpush.msrb.mxu1 %v313_v27 }
  0x60   :  { %347 = vmatpush.msrb.mxu0 %v312_v31 }
  0x61   :  { %412 = vmatpush.msrb.mxu1 %v312_v31 }
  0xbc   :  { %v181_v50 = vpop.f32.mrf.mxu0 }
  0xbd   :  { %219 = vmatmul.f32.vlgmr.msra.gmra.mxu1 %v181_v50 }
  0xc4   :  { %v184_v53 = vpop.f32.mrf.mxu0 }
  0xc5   :  { %222 = vmatmul.f32.gmra.mxu1 %v184_v53 }
 0x13a   :  { %v220_v4 = vpop.f32.mrf.mxu1 }
 0x13b   :  { %262 = vmatmul.f32.vlgmr.msra.gmra.mxu2 %v220_v4 }
 0x142   :  { %v223_v5 = vpop.f32.mrf.mxu1 }
 0x143   :  { %265 = vmatmul.f32.gmra.mxu2 %v223_v5 }
 0x1be   :  { %v263_v21 = vpop.f32.mrf.mxu2 }
 0x1bf   :  { %v264_v22 = vadd.f32 %v425_v18, %v263_v21 }
 0x1c1   :  { %v269_v24 = vmax.f32 %v264_v22, 0.0 }
 0x1c3   :  { %271 = vst [vmem:[#allocation15] sm:$0xff] %v269_v24  ;;  %305 = vmatmul.f32.vlgmr.msra.gmra.mxu3 %v269_v24 }
 0x1c6   :  { %v266_v28 = vpop.f32.mrf.mxu2 }
 0x1c7   :  { %v267_v29 = vadd.f32 %v425_v18, %v266_v28 }
 0x1c9   :  { %v270_v30 = vmax.f32 %v267_v29, 0.0 }
 0x1cb   :  { %272 = vst [vmem:[#allocation15 + $0x8] sm:$0xff] %v270_v30  ;;  %308 = vmatmul.f32.gmra.mxu3 %v270_v30 }
 0x1cc   :  { %382 = dma.vmem_to_hbm [thread:$0]  %s375_s20, 256, %s377_s24, [#allocation16], %s657_s1, %s657_s1, %s658_s22  }
 0x246   :  { %v306_v32 = vpop.f32.mrf.mxu3 }
 0x247   :  { %348 = vmatmul.f32.vlgmr.msrb.gmra.mxu0 %v306_v32 }
 0x24e   :  { %v309_v33 = vpop.f32.mrf.mxu3 }
 0x24f   :  { %351 = vmatmul.f32.vlgmr.msrb.gmra.mxu1 %v309_v33 }
 0x2c4   :  { %v349_v35 = vpop.f32.mrf.mxu0 }
 0x2c5   :  { %v350_v36 = vadd.f32 %v426_v34, %v349_v35 }
 0x2c7   :  { %355 = vst [vmem:[#allocation14] sm:$0xff] %v350_v36 }
 0x2cc   :  { %v352_v37 = vpop.f32.mrf.mxu1 }
 0x2cd   :  { %v353_v38 = vadd.f32 %v426_v34, %v352_v37 }
 0x2cf   :  { %356 = vst [vmem:[#allocation14 + $0x8] sm:$0xff] %v353_v38 }
 0x2d0   :  { %369 = dma.vmem_to_hbm [thread:$0]  %s362_s4, 256, %s364_s27, [#allocation4], %s657_s1, %s657_s1, %s658_s22  }
 0x2d1   :  { %651 = dma.done.wait [#allocation4], 256  }
 0x2d2   :  { %652 = vsyncadd [#allocation4], 4294967040 }
 0x2d3   :  { %653 = dma.done.wait [#allocation16], 256  }
 0x2d4   :  { %654 = vsyncadd [#allocation16], 4294967040 }
 0x2d5   :  { %391 = vsyncpa [#allocation3], 1 }
 0x2d6   :  { %392 = vsyncpa [#allocation6], 1 }
 0x2d7   :  { %393 = vsyncpa [#allocation9], 1 }
 0x2d8   :  { %394 = vsyncpa [#allocation12], 1 }
 0x2d9   :  { %395 = vsyncpa [#allocation4], 1 }
 0x2da   :  { %396 = vsyncpa [#allocation16], 1 }

</bundles_post_ra>
